<compile_context>
chip_gen: v6e
topology: v6e:2x2x1
jax: 0.10.0
libtpu: 0.0.40
codegen_flags: <defaults>
</compile_context>

<pallas_src>
import jax
import jax.numpy as jnp
from jax import lax
from jax.experimental import pallas as pl
from jax.experimental.pallas import tpu as pltpu

# --- module "parameters" (from __init__ / dist defaults) ---------------------
MARGIN = 1.0
EPS = 1e-8

# Tile caps (budgeted for v7x's 64 MiB physical / 32 MiB scoped VMEM; also
# fine on v5e/v6e). tq: sublane dim (multiple of 8); tn: lane dim (mult of 128)
_TQ_MAX = 256
_TN_MAX = 1024
_LANES = 128


def _round_up(x, m):
    return (x + m - 1) // m * m


def _make_contrastive_kernel(tq, tn, use_bf16_mxu):
    n_chunks = tn // _LANES

    def kernel(x0_ref, x1_ref, y_ref, o_ref):
        j = pl.program_id(1)

        # Output block doubles as the accumulator: same block index across the
        # column (reduction) axis, zero it on the first column step.
        @pl.when(j == 0)
        def _init():
            o_ref[...] = jnp.zeros_like(o_ref)

        x0 = x0_ref[...]              # (tq, D) f32 -- resident across j
        x1 = x1_ref[...]              # (tn, D) f32 -- streamed
        y = y_ref[...]                # (1, tn) f32 -- broadcasts over rows i

        d = x0.shape[1]
        contract = (((1,), (1,)), ((), ()))

        # Row norms ||x0_i||^2 (f32) and column norms ||x1_j||^2 produced
        # directly as a lane-major row via an f32 ones-row MXU dot (avoids an
        # (tn,1)->(1,tn) XLU relayout).
        n0 = jnp.sum(x0 * x0, axis=1, keepdims=True)                        # (tq, 1)
        n1 = lax.dot_general(jnp.ones((1, d), jnp.float32), x1 * x1,
                             contract, preferred_element_type=jnp.float32)  # (1, tn)

        # -2 * <x0_i, x1_j>: fold the -2 into the LHS (saves one (tq,tn)
        # multiply); bf16 MXU inputs on v6e/v7x, f32 accumulation.
        if use_bf16_mxu:
            a = (x0 * -2.0).astype(jnp.bfloat16)
            b = x1.astype(jnp.bfloat16)
        else:
            a = x0 * -2.0
            b = x1
        m2_inter = lax.dot_general(a, b, contract,
                                   preferred_element_type=jnp.float32)      # (tq, tn)

        d2 = (n0 + n1) + m2_inter
        dist_sq = jnp.maximum(d2, 0.0) + EPS            # == dist**2
        dist = jnp.sqrt(dist_sq)
        cl = jnp.maximum(MARGIN - dist, 0.0)
        cl2 = cl * cl
        # y*dist_sq + (1-y)*cl^2  ==  cl^2 + y*(dist_sq - cl^2)
        loss = cl2 + y * (dist_sq - cl2)                # (tq, tn)

        # VPU-only fold of the tn lanes into a lane-dense (tq, 128) partial;
        # cross-lane (XLU) reduction is deferred to the wrapper.
        part = loss[:, 0:_LANES]
        for c in range(1, n_chunks):
            part = part + loss[:, c * _LANES:(c + 1) * _LANES]
        o_ref[...] += part

    return kernel


def contrastive_loss(data, *, use_bf16_mxu=True):
    """Mirrors ContrastiveLoss.forward(((x0, x1), y))."""
    (x0, x1), y = data
    # check_type_forward
    assert x0.shape == x1.shape
    assert x1.shape[0] == y.shape[0]
    assert x1.shape[0] > 0
    assert x0.ndim == 2 and x1.ndim == 2 and y.ndim == 1

    n, d = x0.shape
    x0 = x0.astype(jnp.float32)
    x1 = x1.astype(jnp.float32)

    tq = min(_TQ_MAX, _round_up(n, 8))
    tn = min(_TN_MAX, _round_up(n, _LANES))
    np_r = _round_up(n, tq)
    np_c = _round_up(n, tn)

    # Pad x0 rows with zeros: their partial-sum rows are dropped by the [:n]
    # slice on the output. Pad x1 rows with a "far away" sentinel [BIG,0,...]
    # and y with 0 so padded COLUMNS contribute exactly zero:
    #   y=0   -> y*dist_sq term is 0
    #   dist >= BIG - |x0[:,0]| > margin  -> clamp(margin - dist, 0) == 0
    if np_r > n:
        x0 = jnp.concatenate([x0, jnp.zeros((np_r - n, d), jnp.float32)], axis=0)
    y_row = y.astype(jnp.float32).reshape(1, n)
    if np_c > n:
        big = 4.0 * (MARGIN + 1.0 + jnp.max(jnp.abs(x0[:, 0])))
        pad = jnp.zeros((np_c - n, d), jnp.float32).at[:, 0].set(big)
        x1 = jnp.concatenate([x1, pad], axis=0)
        y_row = jnp.concatenate(
            [y_row, jnp.zeros((1, np_c - n), jnp.float32)], axis=1)

    grid = (np_r // tq, np_c // tn)
    kernel = _make_contrastive_kernel(tq, tn, use_bf16_mxu)

    partials = pl.pallas_call(
        kernel,
        out_shape=jax.ShapeDtypeStruct((np_r, _LANES), jnp.float32),
        grid=grid,
        in_specs=[
            pl.BlockSpec((tq, d), lambda i, j: (i, 0)),   # x0: resident row tile
            pl.BlockSpec((tn, d), lambda i, j: (j, 0)),   # x1: streamed col tile
            pl.BlockSpec((1, tn), lambda i, j: (0, j)),   # y : streamed with x1
        ],
        out_specs=pl.BlockSpec((tq, _LANES), lambda i, j: (i, 0)),
        compiler_params=pltpu.CompilerParams(
            dimension_semantics=("parallel", "arbitrary"),
            vmem_limit_bytes=32 * 1024 * 1024,
        ),
    )(x0, x1, y_row)

    # Final cross-lane reduction, padded-row drop and /(2N) in the wrapper.
    return jnp.sum(partials[:n, :]) / 2.0 / n


def contrastive_loss_ref(data):
    """Pure-JAX reference with PyTorch-identical semantics (for validation)."""
    (x0, x1), y = data
    hi = lax.Precision.HIGHEST
    y = y.astype(x0.dtype)
    inter = jnp.matmul(x0, x1.T, precision=hi)
    n0 = jnp.diagonal(jnp.matmul(x0, x0.T, precision=hi))[:, None]
    n1 = jnp.diagonal(jnp.matmul(x1, x1.T, precision=hi))[None, :]
    d2 = n0 - 2.0 * inter + n1
    dist = jnp.sqrt(jnp.maximum(d2, 0.0) + EPS)
    dist_sq = dist ** 2
    cl = jnp.maximum(MARGIN - dist, 0.0)
    loss = y * dist_sq + (1.0 - y) * cl ** 2
    return jnp.sum(loss) / 2.0 / x0.shape[0]


if __name__ == "__main__":
    key = jax.random.PRNGKey(0)
    k0, k1, k2 = jax.random.split(key, 3)

    # Case 1: batch of 8 embedding pairs, embedding dim 32 (module-sized test).
    N, D = 8, 32
    x0 = jax.random.normal(k0, (N, D), dtype=jnp.float32)
    x1 = jax.random.normal(k1, (N, D), dtype=jnp.float32)
    y = jax.random.bernoulli(k2, 0.5, (N,)).astype(jnp.int32)

    loss = contrastive_loss(((x0, x1), y))
    jax.block_until_ready(loss)
    ref = contrastive_loss_ref(((x0, x1), y))
    assert jnp.isfinite(loss), "non-finite loss"
    # bf16 MXU inputs (f32 accumulate) vs. f32 reference: ~1e-3 relative.
    assert jnp.allclose(loss, ref, rtol=1e-2, atol=1e-3), (loss, ref)

    # Case 2: non-multiple-of-tile batch to exercise padding (rows + columns).
    k3, k4, k5 = jax.random.split(jax.random.PRNGKey(1), 3)
    N2, D2 = 37, 48
    a0 = jax.random.normal(k3, (N2, D2), dtype=jnp.float32)
    a1 = jax.random.normal(k4, (N2, D2), dtype=jnp.float32)
    y2 = jax.random.bernoulli(k5, 0.5, (N2,)).astype(jnp.int32)

    loss2 = contrastive_loss(((a0, a1), y2))
    jax.block_until_ready(loss2)
    ref2 = contrastive_loss_ref(((a0, a1), y2))
    assert jnp.isfinite(loss2), "non-finite loss (case 2)"
    assert jnp.allclose(loss2, ref2, rtol=1e-2, atol=1e-3), (loss2, ref2)

    print("KERNEL_OK")
</pallas_src>

<mosaic_0001>
module attributes {stable_mosaic.version = 11 : i64} {
  func.func @kernel(%arg0: i32, %arg1: i32, %arg2: memref<8x32xf32, #tpu.memory_space<vmem>>, %arg3: memref<128x32xf32, #tpu.memory_space<vmem>>, %arg4: memref<1x128xf32, #tpu.memory_space<vmem>>, %arg5: memref<8x128xf32, #tpu.memory_space<vmem>>) attributes {dimension_semantics = [#tpu.dimension_semantics<parallel>, #tpu.dimension_semantics<arbitrary>], iteration_bounds = array<i64: 1, 1>, scalar_prefetch = 0 : i64, scratch_operands = 0 : i64, tpu.core_type = #tpu.core_type<tc>, window_params = [{transform_indices = @transform_0, window_bounds = array<i64: 8, 32>}, {transform_indices = @transform_1, window_bounds = array<i64: 128, 32>}, {transform_indices = @transform_2, window_bounds = array<i64: 1, 128>}, {transform_indices = @transform_3, window_bounds = array<i64: 8, 128>}]} {
    %c0_i32 = arith.constant 0 : i32
    %0 = arith.cmpi eq, %arg1, %c0_i32 : i32
    %1 = arith.extui %0 : i1 to i32
    %c0_i32_0 = arith.constant 0 : i32
    %2 = arith.cmpi ne, %1, %c0_i32_0 : i32
    scf.if %2 {
      %cst_18 = arith.constant 0.000000e+00 : f32
      %38 = vector.broadcast %cst_18 : f32 to vector<8x128xf32>
      %c0_19 = arith.constant 0 : index
      %c0_20 = arith.constant 0 : index
      %39 = vector.load %arg5[%c0_19, %c0_20] : memref<8x128xf32, #tpu.memory_space<vmem>>, vector<8x128xf32>
      tpu.vector_store %arg5[%c0_19, %c0_20], %38 {strides = array<i32>} : memref<8x128xf32, #tpu.memory_space<vmem>>, vector<8x128xf32>,
    } else {
    }
    %c0 = arith.constant 0 : index
    %c0_1 = arith.constant 0 : index
    %3 = vector.load %arg2[%c0, %c0_1] : memref<8x32xf32, #tpu.memory_space<vmem>>, vector<8x32xf32>
    %c0_2 = arith.constant 0 : index
    %c0_3 = arith.constant 0 : index
    %4 = vector.load %arg3[%c0_2, %c0_3] : memref<128x32xf32, #tpu.memory_space<vmem>>, vector<128x32xf32>
    %c0_4 = arith.constant 0 : index
    %c0_5 = arith.constant 0 : index
    %5 = vector.load %arg4[%c0_4, %c0_5] : memref<1x128xf32, #tpu.memory_space<vmem>>, vector<1x128xf32>
    %6 = arith.mulf %3, %3 : vector<8x32xf32>
    %cst = arith.constant dense<0.000000e+00> : vector<8xf32>
    %7 = vector.multi_reduction <add>, %6, %cst [1] : vector<8x32xf32> to vector<8xf32>
    %8 = vector.shape_cast %7 : vector<8xf32> to vector<8x1xf32>
    %cst_6 = arith.constant 1.000000e+00 : f32
    %9 = vector.broadcast %cst_6 : f32 to vector<1x32xf32>
    %10 = arith.mulf %4, %4 : vector<128x32xf32>
    %cst_7 = arith.constant dense<0.000000e+00> : vector<1x128xf32>
    %11 = tpu.matmul %9, %10, %cst_7 {dimension_numbers = #tpu.dot_dimension_numbers<[1], [1], [0], [0], [0, 0, 1, 0], [], []>} : vector<1x32xf32>, vector<128x32xf32>, vector<1x128xf32> -> vector<1x128xf32>
    %cst_8 = arith.constant -2.000000e+00 : f32
    %12 = vector.broadcast %cst_8 : f32 to vector<8x32xf32>
    %13 = arith.mulf %3, %12 : vector<8x32xf32>
    %14 = arith.truncf %13 : vector<8x32xf32> to vector<8x32xbf16>
    %15 = arith.truncf %4 : vector<128x32xf32> to vector<128x32xbf16>
    %cst_9 = arith.constant dense<0.000000e+00> : vector<8x128xf32>
    %16 = tpu.matmul %14, %15, %cst_9 {dimension_numbers = #tpu.dot_dimension_numbers<[1], [1], [0], [0], [0, 0, 1, 0], [], []>} : vector<8x32xbf16>, vector<128x32xbf16>, vector<8x128xf32> -> vector<8x128xf32>
    %17 = vector.broadcast %8 : vector<8x1xf32> to vector<8x128xf32>
    %18 = vector.broadcast %11 : vector<1x128xf32> to vector<8x128xf32>
    %19 = arith.addf %17, %18 : vector<8x128xf32>
    %20 = arith.addf %19, %16 : vector<8x128xf32>
    %cst_10 = arith.constant 0.000000e+00 : f32
    %21 = vector.broadcast %cst_10 : f32 to vector<8x128xf32>
    %22 = arith.maximumf %20, %21 : vector<8x128xf32>
    %cst_11 = arith.constant 9.99999993E-9 : f32
    %23 = vector.broadcast %cst_11 : f32 to vector<8x128xf32>
    %24 = arith.addf %22, %23 : vector<8x128xf32>
    %25 = math.sqrt %24 : vector<8x128xf32>
    %cst_12 = arith.constant 1.000000e+00 : f32
    %26 = vector.broadcast %cst_12 : f32 to vector<8x128xf32>
    %27 = arith.subf %26, %25 : vector<8x128xf32>
    %cst_13 = arith.constant 0.000000e+00 : f32
    %28 = vector.broadcast %cst_13 : f32 to vector<8x128xf32>
    %29 = arith.maximumf %27, %28 : vector<8x128xf32>
    %30 = arith.mulf %29, %29 : vector<8x128xf32>
    %31 = arith.subf %24, %30 : vector<8x128xf32>
    %32 = vector.broadcast %5 : vector<1x128xf32> to vector<8x128xf32>
    %33 = arith.mulf %32, %31 : vector<8x128xf32>
    %34 = arith.addf %30, %33 : vector<8x128xf32>
    %c0_14 = arith.constant 0 : index
    %c0_15 = arith.constant 0 : index
    %35 = vector.load %arg5[%c0_14, %c0_15] : memref<8x128xf32, #tpu.memory_space<vmem>>, vector<8x128xf32>
    %36 = arith.addf %35, %34 : vector<8x128xf32>
    %c0_16 = arith.constant 0 : index
    %c0_17 = arith.constant 0 : index
    %37 = vector.load %arg5[%c0_16, %c0_17] : memref<8x128xf32, #tpu.memory_space<vmem>>, vector<8x128xf32>
    tpu.vector_store %arg5[%c0_16, %c0_17], %36 {strides = array<i32>} : memref<8x128xf32, #tpu.memory_space<vmem>>, vector<8x128xf32>,
    return
  }
  func.func @transform_0(%arg0: i32, %arg1: i32) -> (i32, i32) {
    %c0_i32 = arith.constant 0 : i32
    %c0_i32_0 = arith.constant 0 : i32
    return %arg0, %c0_i32 : i32, i32
  }
  func.func @transform_1(%arg0: i32, %arg1: i32) -> (i32, i32) {
    %c0_i32 = arith.constant 0 : i32
    %c0_i32_0 = arith.constant 0 : i32
    return %arg1, %c0_i32 : i32, i32
  }
  func.func @transform_2(%arg0: i32, %arg1: i32) -> (i32, i32) {
    %c0_i32 = arith.constant 0 : i32
    %c0_i32_0 = arith.constant 0 : i32
    return %c0_i32, %arg1 : i32, i32
  }
  func.func @transform_3(%arg0: i32, %arg1: i32) -> (i32, i32) {
    %c0_i32 = arith.constant 0 : i32
    %c0_i32_0 = arith.constant 0 : i32
    return %arg0, %c0_i32 : i32, i32
  }
}

</mosaic_0001>

<bundles_post_ra>
// kernel: tpu_custom_call.1
= control target key start
LH: loop header
LB: loop body
LE: loop exit
PB: predicated region body
PF: predicated region fallthrough
CT: control target
= control target key end

     0   :  { %vm40_vm0 = vcmask 261120   ;;  %v430_v2 = vmov 0.0   ;;  %vm431_vm1 = vmmov 0   ;;  %s569_s0 = inlined_call_operand.vmem [shape: f32[8,32], index: 0, kind: input, shape index: {}]   ;;  %s570_s1 = inlined_call_operand.vmem [shape: f32[128,32], index: 1, kind: input, shape index: {}]   ;;  %s571_s2 = inlined_call_operand.vmem [shape: f32[1,128], index: 2, kind: input, shape index: {}]   ;;  %s572_s3 = inlined_call_operand.hbm [shape: f32[8,128], index: 3, kind: output, shape index: {}]  }
   0x1   :  { %v37_v0 = vld [vmem:[%s570_s1 + $0x78] sm:$0xff]  ;;  %v36_v1 = vld [vmem:[%s570_s1 + $0x70] sm:$0xff]  ;;  %347 = vmatprep.subr.mxu0 %v430_v2  ;;  %382 = vmatprep.subr.bf16.mxu1 %v430_v2  ;;  %v35_v5 = vld [vmem:[%s570_s1 + $0x68] sm:$0xff] }
   0x2   :  { %v59_v3 = vmul.f32 %v37_v0, %v37_v0  ;;  %v190_v4 = vpack.c.bf16 %v37_v0, %v36_v1  ;;  %v34_v6 = vld [vmem:[%s570_s1 + $0x60] sm:$0xff]  ;;  %379 = vmatprep.mubr.msk.f32.mxu0 %vm431_vm1, %v430_v2  ;;  %v58_v7 = vmul.f32 %v36_v1, %v36_v1  ;;  %398 = vmatprep.mubr.msk.bf16.mxu1 %vm431_vm1, %v430_v2 }
   0x3   :  { %v189_v9 = vpack.c.bf16 %v35_v5, %v34_v6 }
   0x4   :  { %348 = vmatpush3.xpose.msk.msra.mxu0 %vm40_vm0, %v59_v3  ;;  %v216_v8 = vsel %vm40_vm0, %v190_v4, 0 }
   0x5   :  { %383 = vmatpush3.bf16.xpose.msra.mxu1 %v216_v8  ;;  %349 = vmatprep.subr.mxu0 %v430_v2 }
   0x6   :  { %384 = vmatprep.subr.bf16.mxu1 %v430_v2 }
   0x7   :  { %8 = vsyncpa [#allocation3], 0  ;;  %v57_v10 = vmul.f32 %v35_v5, %v35_v5  ;;  %v479_v11 = vld [vmem:[%s569_s0] sm:$0xff]  ;;  %v213_v12 = vsel %vm40_vm0, %v189_v9, 0  ;;  %v33_v14 = vld [vmem:[%s570_s1 + $0x58] sm:$0xff]  ;;  %v56_v16 = vmul.f32 %v34_v6, %v34_v6  ;;  %v432_v54 = vmov 1.0  }
   0x8   :  { %350 = vmatpush3.xpose.msk.msra.mxu0 %vm40_vm0, %v58_v7  ;;  %v39_v13 = vmul.f32 %v479_v11, %v479_v11  ;;  %v32_v15 = vld [vmem:[%s570_s1 + $0x50] sm:$0xff]  ;;  %v55_v19 = vmul.f32 %v33_v14, %v33_v14  ;;  %v31_v21 = vld [vmem:[%s570_s1 + $0x48] sm:$0xff]  ;;  %v30_v22 = vld [vmem:[%s570_s1 + $0x40] sm:$0xff]  ;;  %v181_v52 = vmul.f32 -2.0, %v479_v11  ;;  %v258_v55 = vlaneseq  ;;  %s433_s19 = smov [#allocation2]  }
   0x9   :  { %351 = vmatprep.subr.mxu0 %v430_v2  ;;  %v188_v18 = vpack.c.bf16 %v33_v14, %v32_v15  ;;  %v54_v23 = vmul.f32 %v32_v15, %v32_v15  ;;  %v187_v24 = vpack.c.bf16 %v31_v21, %v30_v22  ;;  %v53_v25 = vmul.f32 %v31_v21, %v31_v21  ;;  %v29_v27 = vld [vmem:[%s570_s1 + $0x38] sm:$0xff]  ;;  %v28_v28 = vld [vmem:[%s570_s1 + $0x30] sm:$0xff]  ;;  %v27_v33 = vld [vmem:[%s570_s1 + $0x28] sm:$0xff]  ;;  %s294_s20 = sshll.u32 %s433_s19, 4  ;;  %s295_s20 = int_to_ptr.vmem [resolvable:$true] %s294_s20 }
   0xa   :  { %v41_v17 = vsel %vm40_vm0, %v39_v13, 0.0  ;;  %v52_v29 = vmul.f32 %v30_v22, %v30_v22  ;;  %v186_v30 = vpack.c.bf16 %v29_v27, %v28_v28  ;;  %v51_v31 = vmul.f32 %v29_v27, %v29_v27  ;;  %v26_v34 = vld [vmem:[%s570_s1 + $0x20] sm:$0xff]  ;;  %v25_v39 = vld [vmem:[%s570_s1 + $0x18] sm:$0xff]  ;;  %v24_v40 = vld [vmem:[%s570_s1 + $0x10] sm:$0xff]  ;;  %s408_s21 = scalar_lea.vmem %s295_s20, 128  ;;  %p413_p1 = scmp.lt.s32.totalorder %s295_s20, %s295_s20 }
   0xb   :  { %42 = vadd.xlane.f32.xlu0 %v41_v17  ;;  %v210_v20 = vsel %vm40_vm0, %v188_v18, 0  ;;  %v207_v26 = vsel %vm40_vm0, %v187_v24, 0  ;;  %v50_v35 = vmul.f32 %v28_v28, %v28_v28  ;;  %v185_v36 = vpack.c.bf16 %v27_v33, %v26_v34  ;;  %v23_v45 = vld [vmem:[%s570_s1 + $0x8] sm:$0xff]  ;;  %v22_v46 = vld [vmem:[%s570_s1] sm:$0xff]  ;;  %p409_p0 = scmp.ne.s32.totalorder %s295_s20, %s408_s21  ;;  %p414_p2 = scmp.lt.s32.totalorder %s408_s21, %s408_s21 }
   0xc   :  { %352 = vmatpush3.xpose.msk.msra.mxu0 %vm40_vm0, %v57_v10  ;;  %v204_v32 = vsel %vm40_vm0, %v186_v30, 0  ;;  %v49_v37 = vmul.f32 %v27_v33, %v27_v33  ;;  %v48_v41 = vmul.f32 %v26_v34, %v26_v34  ;;  %v184_v42 = vpack.c.bf16 %v25_v39, %v24_v40  ;;  %v320_v14 = vld [vmem:[%s571_s2] ss:$0 sm:$0xff] }
   0xd   :  { %385 = vmatpush3.bf16.xpose.msra.mxu1 %v213_v12  ;;  %353 = vmatprep.subr.mxu0 %v430_v2  ;;  %v201_v38 = vsel %vm40_vm0, %v185_v36, 0  ;;  %v47_v43 = vmul.f32 %v25_v39, %v25_v39  ;;  %v46_v47 = vmul.f32 %v24_v40, %v24_v40  ;;  %v183_v48 = vpack.c.bf16 %v23_v45, %v22_v46  ;;  %p415_p3 = por %p414_p2, %p413_p1 }
   0xe   :  { %386 = vmatprep.subr.bf16.mxu1 %v430_v2  ;;  %v198_v44 = vsel %vm40_vm0, %v184_v42, 0  ;;  %v45_v49 = vmul.f32 %v23_v45, %v23_v45  ;;  %v44_v51 = vmul.f32 %v22_v46, %v22_v46  ;;  %v182_v53 = vpack.c.bf16 %v181_v52, %v181_v52 }
   0xf   :  { %v195_v50 = vsel %vm40_vm0, %v183_v48, 0  ;;  %v259_v56 = vshrl.u32 %v258_v55, 7  ;;  %p416_p4 = pnand %p415_p3, %p409_p0 }
  0x10   :  { %354 = vmatpush3.xpose.msk.msra.mxu0 %vm40_vm0, %v56_v16 }
  0x11   :  { %355 = vmatprep.subr.mxu0 %v430_v2  ;;  %v260_v57 = vsub.s32 0, %v259_v56 }
  0x14   :  { %356 = vmatpush3.xpose.msk.msra.mxu0 %vm40_vm0, %v55_v19 }
  0x15   :  { %387 = vmatpush3.bf16.xpose.msra.mxu1 %v210_v20  ;;  %357 = vmatprep.subr.mxu0 %v430_v2 }
  0x16   :  { %388 = vmatprep.subr.bf16.mxu1 %v430_v2 }
  0x18   :  { %358 = vmatpush3.xpose.msk.msra.mxu0 %vm40_vm0, %v54_v23 }
  0x19   :  { %359 = vmatprep.subr.mxu0 %v430_v2 }
  0x1c   :  { %360 = vmatpush3.xpose.msk.msra.mxu0 %vm40_vm0, %v53_v25 }
  0x1d   :  { %389 = vmatpush3.bf16.xpose.msra.mxu1 %v207_v26  ;;  %361 = vmatprep.subr.mxu0 %v430_v2 }
  0x1e   :  { %390 = vmatprep.subr.bf16.mxu1 %v430_v2 }
  0x20   :  { %362 = vmatpush3.xpose.msk.msra.mxu0 %vm40_vm0, %v52_v29 }
  0x21   :  { %363 = vmatprep.subr.mxu0 %v430_v2 }
  0x24   :  { %364 = vmatpush3.xpose.msk.msra.mxu0 %vm40_vm0, %v51_v31 }
  0x25   :  { %391 = vmatpush3.bf16.xpose.msra.mxu1 %v204_v32  ;;  %365 = vmatprep.subr.mxu0 %v430_v2 }
  0x26   :  { %392 = vmatprep.subr.bf16.mxu1 %v430_v2 }
  0x28   :  { %366 = vmatpush3.xpose.msk.msra.mxu0 %vm40_vm0, %v50_v35 }
  0x29   :  { %367 = vmatprep.subr.mxu0 %v430_v2 }
  0x2c   :  { %368 = vmatpush3.xpose.msk.msra.mxu0 %vm40_vm0, %v49_v37 }
  0x2d   :  { %393 = vmatpush3.bf16.xpose.msra.mxu1 %v201_v38  ;;  %369 = vmatprep.subr.mxu0 %v430_v2 }
  0x2e   :  { %394 = vmatprep.subr.bf16.mxu1 %v430_v2 }
  0x30   :  { %370 = vmatpush3.xpose.msk.msra.mxu0 %vm40_vm0, %v48_v41 }
  0x31   :  { %371 = vmatprep.subr.mxu0 %v430_v2 }
  0x34   :  { %372 = vmatpush3.xpose.msk.msra.mxu0 %vm40_vm0, %v47_v43 }
  0x35   :  { %395 = vmatpush3.bf16.xpose.msra.mxu1 %v198_v44  ;;  %373 = vmatprep.subr.mxu0 %v430_v2 }
  0x36   :  { %396 = vmatprep.subr.bf16.mxu1 %v430_v2 }
  0x38   :  { %374 = vmatpush3.xpose.msk.msra.mxu0 %vm40_vm0, %v46_v47 }
  0x39   :  { %375 = vmatprep.subr.mxu0 %v430_v2 }
  0x3c   :  { %376 = vmatpush3.xpose.msk.msra.mxu0 %vm40_vm0, %v45_v49 }
  0x3d   :  { %397 = vmatpush3.bf16.xpose.msra.mxu1 %v195_v50  ;;  %377 = vmatprep.subr.mxu0 %v430_v2 }
  0x40   :  { %378 = vmatpush3.xpose.msk.msra.mxu0 %vm40_vm0, %v44_v51 }
  0x43   :  { %380 = vmatmul.mubr.msk.f32.vlgmr.msra.gmra.mxu0 %vm40_vm0, %v432_v54 }
  0x44   :  { %399 = vmatmul.mubr.msk.bf16.vlgmr.msra.gmra.mxu1 %vm40_vm0, %v182_v53 }
  0x94   :  { %v43_v59 = vpop.xlane.xlu0 %42 }
 0x103   :  { %v177_v58 = vpop.f32.mrf.mxu0 }
 0x104   :  { %v261_v60 = vrot.slane %v177_v58, %v260_v57  ;;  %v252_v61 = vpop.f32.mrf.mxu1 }
 0x105   :  { %v381_v62 = vpop.f32.mrf.mxu0 }
 0x106   :  { %v262_v63 = vadd.f32 %v261_v60, %v43_v59  ;;  %v400_v0 = vpop.f32.mrf.mxu1 }
 0x108   :  { %v263_v1 = vadd.f32 %v262_v63, %v252_v61  ;;  %v255_v2 = vpop.f32.mrf.mxu1 }
 0x10a   :  { %v264_v3 = vmax.f32 %v263_v1, 0.0  ;;  %v401_v4 = vpop.f32.mrf.mxu1 }
 0x10c   :  { %v265_v5 = vadd.f32 1e-08, %v264_v3 }
 0x10e   :  { %406 = vrsqrt.f32 %v265_v5  ;;  %vm268_vm2 = vcmp.eq.f32.partialorder %v265_v5, inf  ;;  %v271_v8 = vand.u32 2147483648, %v265_v5  ;;  %vm270_vm3 = vcmp.eq.f32.partialorder %v265_v5, 0.0 }
 0x11b   :  { %v407_v6 = vpop.eup %406 }
 0x11c   :  { %v267_v7 = vmul.f32 %v407_v6, %v265_v5 }
 0x11e   :  { %v269_v9 = vsel %vm268_vm2, %v265_v5, %v267_v7 }
 0x11f   :  { %v272_v10 = vsel %vm270_vm3, %v271_v8, %v269_v9 }
 0x120   :  { %v273_v11 = vsub.f32 1.0, %v272_v10 }
 0x122   :  { %v274_v12 = vmax.f32 %v273_v11, 0.0 }
 0x124   :  { %v275_v13 = vmul.f32 %v274_v12, %v274_v12 }
 0x126   :  { %v276_v15 = vsub.f32 %v265_v5, %v275_v13 }
 0x128   :  { %v283_v16 = vmul.f32 %v320_v14, %v276_v15 }
 0x12a   :  { %v284_v17 = vadd.f32 %v283_v16, %v275_v13 }
 0x12c   :  { %287 = vst [vmem:[#allocation2] sm:$0xff] %v284_v17 }
 0x12d   :  { %419 = shalt.err (!%p416_p4)
}
 0x12e   :  { %297 = dma.vmem_to_hbm [thread:$0]  %s295_s20, 128, %s572_s3, [#allocation3]  }
 0x12f   :  { %428 = dma.done.wait [#allocation3], 128  }
 0x130   :  { %429 = vsyncadd [#allocation3], 4294967168 }
 0x131   :  { %301 = vsyncpa [#allocation3], 1 }

</bundles_post_ra>
